<compile_context>
chip_gen: v7x
topology: tpu7x:2x2x1
jax: 0.10.0
libtpu: 0.0.40
codegen_flags: <defaults>
</compile_context>

<pallas_src>
import functools

import jax
import jax.numpy as jnp
from jax.experimental import pallas as pl
from jax.experimental.pallas import tpu as pltpu


def _param_offsets(dims):
    """Static (w_offset, b_offset) per layer inside the packed parameter slab."""
    offs, off = [], 0
    for i in range(1, len(dims)):
        d_in, d_out = dims[i - 1], dims[i]
        offs.append((off, off + d_in * d_out))
        off += d_in * d_out + d_out
    return offs, off


def pack_params(layer_params):
    """Pack [(W [out,in], b [out]), ...] into one flat f32 slab.  Call ONCE at init."""
    pieces = []
    for w, b in layer_params:
        pieces.append(jnp.asarray(w, jnp.float32).reshape(-1))
        pieces.append(jnp.asarray(b, jnp.float32).reshape(-1))
    return jnp.concatenate(pieces)


def mlp_kernel(p_ref, x_ref, o_ref, *, dims):
    """Feature-major MLP tile.

    p_ref : SMEM f32[n_params]       packed (W, b) per layer, PyTorch [out, in] order
    x_ref : VMEM f32[dims[0],  TB]   batch on the lane axis
    o_ref : VMEM f32[dims[-1], TB]   log-probs, lane-dense stores
    """
    offsets, _ = _param_offsets(dims)

    # Current activations: one lane-dense [1, TB] row vector per feature.
    acts = [x_ref[k:k + 1, :] for k in range(dims[0])]

    # Each Linear is fully unrolled as scalar-broadcast FMAs on the VPU
    # (K is 5 / 3 — far too small to be worth the MXU push/pop latency).
    for li in range(1, len(dims)):
        d_in, d_out = dims[li - 1], dims[li]
        w_off, b_off = offsets[li - 1]
        new_acts = []
        for j in range(d_out):
            acc = acts[0] * p_ref[w_off + j * d_in]
            for k in range(1, d_in):
                acc = acc + acts[k] * p_ref[w_off + j * d_in + k]
            acc = acc + p_ref[b_off + j]
            # ReLU after every layer, *including the last* — matches the
            # reference module (self.relu is applied before log-softmax).
            new_acts.append(jnp.maximum(acc, 0.0))
        acts = new_acts

    # Log-softmax over the class axis (classes live on separate row vectors),
    # so this is pure elementwise work — no cross-lane reduce needed.
    if len(acts) == 2:
        # 2-class shortcut: lse = max + softplus(-|a0 - a1|)  (a single exp on the EUP)
        lse = jnp.maximum(acts[0], acts[1]) + jnp.log(
            1.0 + jnp.exp(-jnp.abs(acts[0] - acts[1])))
    else:
        m = acts[0]
        for a in acts[1:]:
            m = jnp.maximum(m, a)
        s = jnp.exp(acts[0] - m)
        for a in acts[1:]:
            s = s + jnp.exp(a - m)
        lse = m + jnp.log(s)

    for j, a in enumerate(acts):
        o_ref[j:j + 1, :] = a - lse


def _pick_batch_tile(batch):
    # Lane-axis tile: multiples of 128 pipeline cleanly; tiny / ragged batches
    # just use one full block (allowed when the block equals the array dim).
    if batch >= 512 and batch % 512 == 0:
        return 512
    if batch >= 128 and batch % 128 == 0:
        return 128
    return batch


def mlp_forward(x, packed_params, dims):
    """x: [B, dims[0]] (PyTorch convention) -> log-probs [B, dims[-1]]."""
    batch = x.shape[0]
    d_in, d_out = dims[0], dims[-1]

    # Layout plumbing only: present batch on the lane axis so every kernel
    # load/store is lane-dense.  (The 4 per-call weight transposes/reshapes of
    # the previous version are gone — parameters are packed once at init.)
    x_t = jnp.transpose(x)                                   # [d_in, B]

    tb = _pick_batch_tile(batch)
    grid = (pl.cdiv(batch, tb),)

    out_t = pl.pallas_call(
        functools.partial(mlp_kernel, dims=tuple(dims)),
        out_shape=jax.ShapeDtypeStruct((d_out, batch), jnp.float32),
        grid=grid,
        in_specs=[
            # Whole parameter slab, resident in SMEM across all grid steps.
            pl.BlockSpec(memory_space=pltpu.MemorySpace.SMEM),
            # x tile: all features, TB batch columns.
            pl.BlockSpec((d_in, tb), lambda i: (0, i)),
        ],
        out_specs=pl.BlockSpec((d_out, tb), lambda i: (0, i)),
        compiler_params=pltpu.CompilerParams(
            dimension_semantics=("parallel",)),  # batch shards across both TCs on v7x
    )(packed_params, x_t)

    return jnp.transpose(out_t)                              # back to [B, d_out]


def _init_linear(key, out_dim, in_dim):
    """Deterministic init mimicking torch.nn.Linear default (uniform +/- 1/sqrt(in))."""
    kw, kb = jax.random.split(key)
    bound = 1.0 / jnp.sqrt(jnp.float32(in_dim))
    w = jax.random.uniform(kw, (out_dim, in_dim), jnp.float32, -bound, bound)
    b = jax.random.uniform(kb, (out_dim,), jnp.float32, -bound, bound)
    return w, b


if __name__ == "__main__":
    dims = [5, 3, 2]
    batch = 8

    key = jax.random.PRNGKey(0)
    k_x, k_l1, k_l2 = jax.random.split(key, 3)

    x = jax.random.normal(k_x, (batch, dims[0]), jnp.float32)
    w1, b1 = _init_linear(k_l1, dims[1], dims[0])
    w2, b2 = _init_linear(k_l2, dims[2], dims[1])

    # Parameters are packed exactly once ("at module init").
    packed = pack_params([(w1, b1), (w2, b2)])

    fwd = jax.jit(lambda xx, pp: mlp_forward(xx, pp, dims))
    out = fwd(x, packed)
    jax.block_until_ready(out)

    # Pure-JAX reference of the PyTorch forward (classification branch).
    def reference(xx):
        h = jnp.maximum(xx @ w1.T + b1, 0.0)
        h = jnp.maximum(h @ w2.T + b2, 0.0)    # ReLU after last layer, as in the module
        return jax.nn.log_softmax(h, axis=-1)

    expect = reference(x)
    assert out.shape == (batch, dims[-1])
    assert bool(jnp.all(jnp.abs(out - expect) < 1e-5))
    row_sums = jnp.sum(jnp.exp(out), axis=-1)
    assert bool(jnp.all(jnp.abs(row_sums - 1.0) < 1e-5))

    print("KERNEL_OK")
</pallas_src>

<mosaic_0001>
module attributes {stable_mosaic.version = 11 : i64} {
  func.func @mlp_kernel(%arg0: i32, %arg1: memref<26xf32, #tpu.memory_space<smem>>, %arg2: memref<5x8xf32, #tpu.memory_space<vmem>>, %arg3: memref<2x8xf32, #tpu.memory_space<vmem>>) attributes {dimension_semantics = [#tpu.dimension_semantics<parallel>], iteration_bounds = array<i64: 1>, scalar_prefetch = 0 : i64, scratch_operands = 0 : i64, tpu.core_type = #tpu.core_type<tc>, window_params = [{transform_indices = @transform_0, window_bounds = array<i64: 26>}, {transform_indices = @transform_1, window_bounds = array<i64: 5, 8>}, {transform_indices = @transform_2, window_bounds = array<i64: 2, 8>}]} {
    %c0 = arith.constant 0 : index
    %c0_0 = arith.constant 0 : index
    %0 = vector.load %arg2[%c0, %c0_0] : memref<5x8xf32, #tpu.memory_space<vmem>>, vector<1x8xf32>
    %c1 = arith.constant 1 : index
    %c0_1 = arith.constant 0 : index
    %1 = vector.load %arg2[%c1, %c0_1] : memref<5x8xf32, #tpu.memory_space<vmem>>, vector<1x8xf32>
    %c2 = arith.constant 2 : index
    %c0_2 = arith.constant 0 : index
    %2 = vector.load %arg2[%c2, %c0_2] : memref<5x8xf32, #tpu.memory_space<vmem>>, vector<1x8xf32>
    %c3 = arith.constant 3 : index
    %c0_3 = arith.constant 0 : index
    %3 = vector.load %arg2[%c3, %c0_3] : memref<5x8xf32, #tpu.memory_space<vmem>>, vector<1x8xf32>
    %c4 = arith.constant 4 : index
    %c0_4 = arith.constant 0 : index
    %4 = vector.load %arg2[%c4, %c0_4] : memref<5x8xf32, #tpu.memory_space<vmem>>, vector<1x8xf32>
    %c0_5 = arith.constant 0 : index
    %5 = memref.load %arg1[%c0_5] : memref<26xf32, #tpu.memory_space<smem>>
    %6 = vector.broadcast %5 : f32 to vector<1x8xf32>
    %7 = arith.mulf %0, %6 : vector<1x8xf32>
    %c1_6 = arith.constant 1 : index
    %8 = memref.load %arg1[%c1_6] : memref<26xf32, #tpu.memory_space<smem>>
    %9 = vector.broadcast %8 : f32 to vector<1x8xf32>
    %10 = arith.mulf %1, %9 : vector<1x8xf32>
    %11 = arith.addf %7, %10 : vector<1x8xf32>
    %c2_7 = arith.constant 2 : index
    %12 = memref.load %arg1[%c2_7] : memref<26xf32, #tpu.memory_space<smem>>
    %13 = vector.broadcast %12 : f32 to vector<1x8xf32>
    %14 = arith.mulf %2, %13 : vector<1x8xf32>
    %15 = arith.addf %11, %14 : vector<1x8xf32>
    %c3_8 = arith.constant 3 : index
    %16 = memref.load %arg1[%c3_8] : memref<26xf32, #tpu.memory_space<smem>>
    %17 = vector.broadcast %16 : f32 to vector<1x8xf32>
    %18 = arith.mulf %3, %17 : vector<1x8xf32>
    %19 = arith.addf %15, %18 : vector<1x8xf32>
    %c4_9 = arith.constant 4 : index
    %20 = memref.load %arg1[%c4_9] : memref<26xf32, #tpu.memory_space<smem>>
    %21 = vector.broadcast %20 : f32 to vector<1x8xf32>
    %22 = arith.mulf %4, %21 : vector<1x8xf32>
    %23 = arith.addf %19, %22 : vector<1x8xf32>
    %c15 = arith.constant 15 : index
    %24 = memref.load %arg1[%c15] : memref<26xf32, #tpu.memory_space<smem>>
    %25 = vector.broadcast %24 : f32 to vector<1x8xf32>
    %26 = arith.addf %23, %25 : vector<1x8xf32>
    %cst = arith.constant 0.000000e+00 : f32
    %27 = vector.broadcast %cst : f32 to vector<1x8xf32>
    %28 = arith.maximumf %26, %27 : vector<1x8xf32>
    %c5 = arith.constant 5 : index
    %29 = memref.load %arg1[%c5] : memref<26xf32, #tpu.memory_space<smem>>
    %30 = vector.broadcast %29 : f32 to vector<1x8xf32>
    %31 = arith.mulf %0, %30 : vector<1x8xf32>
    %c6 = arith.constant 6 : index
    %32 = memref.load %arg1[%c6] : memref<26xf32, #tpu.memory_space<smem>>
    %33 = vector.broadcast %32 : f32 to vector<1x8xf32>
    %34 = arith.mulf %1, %33 : vector<1x8xf32>
    %35 = arith.addf %31, %34 : vector<1x8xf32>
    %c7 = arith.constant 7 : index
    %36 = memref.load %arg1[%c7] : memref<26xf32, #tpu.memory_space<smem>>
    %37 = vector.broadcast %36 : f32 to vector<1x8xf32>
    %38 = arith.mulf %2, %37 : vector<1x8xf32>
    %39 = arith.addf %35, %38 : vector<1x8xf32>
    %c8 = arith.constant 8 : index
    %40 = memref.load %arg1[%c8] : memref<26xf32, #tpu.memory_space<smem>>
    %41 = vector.broadcast %40 : f32 to vector<1x8xf32>
    %42 = arith.mulf %3, %41 : vector<1x8xf32>
    %43 = arith.addf %39, %42 : vector<1x8xf32>
    %c9 = arith.constant 9 : index
    %44 = memref.load %arg1[%c9] : memref<26xf32, #tpu.memory_space<smem>>
    %45 = vector.broadcast %44 : f32 to vector<1x8xf32>
    %46 = arith.mulf %4, %45 : vector<1x8xf32>
    %47 = arith.addf %43, %46 : vector<1x8xf32>
    %c16 = arith.constant 16 : index
    %48 = memref.load %arg1[%c16] : memref<26xf32, #tpu.memory_space<smem>>
    %49 = vector.broadcast %48 : f32 to vector<1x8xf32>
    %50 = arith.addf %47, %49 : vector<1x8xf32>
    %cst_10 = arith.constant 0.000000e+00 : f32
    %51 = vector.broadcast %cst_10 : f32 to vector<1x8xf32>
    %52 = arith.maximumf %50, %51 : vector<1x8xf32>
    %c10 = arith.constant 10 : index
    %53 = memref.load %arg1[%c10] : memref<26xf32, #tpu.memory_space<smem>>
    %54 = vector.broadcast %53 : f32 to vector<1x8xf32>
    %55 = arith.mulf %0, %54 : vector<1x8xf32>
    %c11 = arith.constant 11 : index
    %56 = memref.load %arg1[%c11] : memref<26xf32, #tpu.memory_space<smem>>
    %57 = vector.broadcast %56 : f32 to vector<1x8xf32>
    %58 = arith.mulf %1, %57 : vector<1x8xf32>
    %59 = arith.addf %55, %58 : vector<1x8xf32>
    %c12 = arith.constant 12 : index
    %60 = memref.load %arg1[%c12] : memref<26xf32, #tpu.memory_space<smem>>
    %61 = vector.broadcast %60 : f32 to vector<1x8xf32>
    %62 = arith.mulf %2, %61 : vector<1x8xf32>
    %63 = arith.addf %59, %62 : vector<1x8xf32>
    %c13 = arith.constant 13 : index
    %64 = memref.load %arg1[%c13] : memref<26xf32, #tpu.memory_space<smem>>
    %65 = vector.broadcast %64 : f32 to vector<1x8xf32>
    %66 = arith.mulf %3, %65 : vector<1x8xf32>
    %67 = arith.addf %63, %66 : vector<1x8xf32>
    %c14 = arith.constant 14 : index
    %68 = memref.load %arg1[%c14] : memref<26xf32, #tpu.memory_space<smem>>
    %69 = vector.broadcast %68 : f32 to vector<1x8xf32>
    %70 = arith.mulf %4, %69 : vector<1x8xf32>
    %71 = arith.addf %67, %70 : vector<1x8xf32>
    %c17 = arith.constant 17 : index
    %72 = memref.load %arg1[%c17] : memref<26xf32, #tpu.memory_space<smem>>
    %73 = vector.broadcast %72 : f32 to vector<1x8xf32>
    %74 = arith.addf %71, %73 : vector<1x8xf32>
    %cst_11 = arith.constant 0.000000e+00 : f32
    %75 = vector.broadcast %cst_11 : f32 to vector<1x8xf32>
    %76 = arith.maximumf %74, %75 : vector<1x8xf32>
    %c18 = arith.constant 18 : index
    %77 = memref.load %arg1[%c18] : memref<26xf32, #tpu.memory_space<smem>>
    %78 = vector.broadcast %77 : f32 to vector<1x8xf32>
    %79 = arith.mulf %28, %78 : vector<1x8xf32>
    %c19 = arith.constant 19 : index
    %80 = memref.load %arg1[%c19] : memref<26xf32, #tpu.memory_space<smem>>
    %81 = vector.broadcast %80 : f32 to vector<1x8xf32>
    %82 = arith.mulf %52, %81 : vector<1x8xf32>
    %83 = arith.addf %79, %82 : vector<1x8xf32>
    %c20 = arith.constant 20 : index
    %84 = memref.load %arg1[%c20] : memref<26xf32, #tpu.memory_space<smem>>
    %85 = vector.broadcast %84 : f32 to vector<1x8xf32>
    %86 = arith.mulf %76, %85 : vector<1x8xf32>
    %87 = arith.addf %83, %86 : vector<1x8xf32>
    %c24 = arith.constant 24 : index
    %88 = memref.load %arg1[%c24] : memref<26xf32, #tpu.memory_space<smem>>
    %89 = vector.broadcast %88 : f32 to vector<1x8xf32>
    %90 = arith.addf %87, %89 : vector<1x8xf32>
    %cst_12 = arith.constant 0.000000e+00 : f32
    %91 = vector.broadcast %cst_12 : f32 to vector<1x8xf32>
    %92 = arith.maximumf %90, %91 : vector<1x8xf32>
    %c21 = arith.constant 21 : index
    %93 = memref.load %arg1[%c21] : memref<26xf32, #tpu.memory_space<smem>>
    %94 = vector.broadcast %93 : f32 to vector<1x8xf32>
    %95 = arith.mulf %28, %94 : vector<1x8xf32>
    %c22 = arith.constant 22 : index
    %96 = memref.load %arg1[%c22] : memref<26xf32, #tpu.memory_space<smem>>
    %97 = vector.broadcast %96 : f32 to vector<1x8xf32>
    %98 = arith.mulf %52, %97 : vector<1x8xf32>
    %99 = arith.addf %95, %98 : vector<1x8xf32>
    %c23 = arith.constant 23 : index
    %100 = memref.load %arg1[%c23] : memref<26xf32, #tpu.memory_space<smem>>
    %101 = vector.broadcast %100 : f32 to vector<1x8xf32>
    %102 = arith.mulf %76, %101 : vector<1x8xf32>
    %103 = arith.addf %99, %102 : vector<1x8xf32>
    %c25 = arith.constant 25 : index
    %104 = memref.load %arg1[%c25] : memref<26xf32, #tpu.memory_space<smem>>
    %105 = vector.broadcast %104 : f32 to vector<1x8xf32>
    %106 = arith.addf %103, %105 : vector<1x8xf32>
    %cst_13 = arith.constant 0.000000e+00 : f32
    %107 = vector.broadcast %cst_13 : f32 to vector<1x8xf32>
    %108 = arith.maximumf %106, %107 : vector<1x8xf32>
    %109 = arith.maximumf %92, %108 : vector<1x8xf32>
    %110 = arith.subf %92, %108 : vector<1x8xf32>
    %111 = math.absf %110 : vector<1x8xf32>
    %cst_14 = arith.constant 0.000000e+00 : f32
    %112 = vector.broadcast %cst_14 : f32 to vector<1x8xf32>
    %113 = arith.subf %112, %111 : vector<1x8xf32>
    %114 = math.exp %113 : vector<1x8xf32>
    %cst_15 = arith.constant 1.000000e+00 : f32
    %115 = vector.broadcast %cst_15 : f32 to vector<1x8xf32>
    %116 = arith.addf %115, %114 : vector<1x8xf32>
    %117 = math.log %116 : vector<1x8xf32>
    %118 = arith.addf %109, %117 : vector<1x8xf32>
    %119 = arith.subf %92, %118 : vector<1x8xf32>
    %c0_16 = arith.constant 0 : index
    %c0_17 = arith.constant 0 : index
    %120 = vector.load %arg3[%c0_16, %c0_17] : memref<2x8xf32, #tpu.memory_space<vmem>>, vector<1x8xf32>
    tpu.vector_store %arg3[%c0_16, %c0_17], %119 {strides = array<i32>} : memref<2x8xf32, #tpu.memory_space<vmem>>, vector<1x8xf32>,
    %121 = arith.subf %108, %118 : vector<1x8xf32>
    %c1_18 = arith.constant 1 : index
    %c0_19 = arith.constant 0 : index
    %122 = vector.load %arg3[%c1_18, %c0_19] : memref<2x8xf32, #tpu.memory_space<vmem>>, vector<1x8xf32>
    tpu.vector_store %arg3[%c1_18, %c0_19], %121 {strides = array<i32>} : memref<2x8xf32, #tpu.memory_space<vmem>>, vector<1x8xf32>,
    return
  }
  func.func @transform_0(%arg0: i32) -> i32 {
    %c0_i32 = arith.constant 0 : i32
    %c0_i32_0 = arith.constant 0 : i32
    return %c0_i32 : i32
  }
  func.func @transform_1(%arg0: i32) -> (i32, i32) {
    %c0_i32 = arith.constant 0 : i32
    %c0_i32_0 = arith.constant 0 : i32
    return %c0_i32, %arg0 : i32, i32
  }
  func.func @transform_2(%arg0: i32) -> (i32, i32) {
    %c0_i32 = arith.constant 0 : i32
    %c0_i32_0 = arith.constant 0 : i32
    return %c0_i32, %arg0 : i32, i32
  }
}

</mosaic_0001>

<bundles_post_ra>
// kernel: _lambda_.1
= control target key start
LH: loop header
LB: loop body
LE: loop exit
PB: predicated region body
PF: predicated region fallthrough
CT: control target
= control target key end

     0   :  { %7 = vsyncpa [#allocation4], 0  ;;  %s320_s0 = inlined_call_operand.vmem [shape: f32[26], index: 0, kind: input, shape index: {}]   ;;  %s321_s1 = inlined_call_operand.vmem [shape: f32[5,8], index: 1, kind: input, shape index: {}]   ;;  %s322_s2 = inlined_call_operand.hbm [shape: f32[2,8], index: 2, kind: output, shape index: {}]  }
   0x1   :  { %8 = vsyncpa [#allocation3], 0  ;;  %s15_s11 = sshll.u32 %s320_s0, 4  ;;  %s16_s11 = int_to_ptr.vmem [resolvable:$true] %s15_s11 }
   0x2   :  { %s190_s12 = scalar_lea.vmem %s16_s11, 16  ;;  %p195_p1 = scmp.lt.s32.totalorder %s16_s11, %s16_s11 }
   0x3   :  { %p191_p0 = scmp.ne.s32.totalorder %s16_s11, %s190_s12  ;;  %p196_p2 = scmp.lt.s32.totalorder %s190_s12, %s190_s12 }
   0x5   :  { %p197_p3 = por %p196_p2, %p195_p1 }
   0x7   :  { %p198_p4 = pnand %p197_p3, %p191_p0 }
   0x9   :  { %201 = shalt.err (!%p198_p4)
}
   0xa   :  { %s228_s13 = smov [#allocation2]  }
   0xb   :  { %18 = dma.vmem_to_smem %s16_s11, 16, %s228_s13, [#allocation4]  }
   0xc   :  { %224 = dma.done.wait [#allocation4], 16  }
   0xd   :  { %225 = vsyncadd [#allocation4], 4294967280 }
   0xe   :  { %24 = sfence }
   0xf   :  { %s30_s14 = sld [smem:[#allocation2]]  ;;  %s159_s15 = sld [smem:[#allocation2 + $0x1]]  ;;  %v25_v0 = vld [vmem:[%s321_s1] sm:$0x1]  ;;  %v26_v1 = vld [vmem:[%s321_s1 + $0x1] sm:$0x1] }
  0x10   :  { %s160_s16 = sld [smem:[#allocation2 + $0x2]]  ;;  %s161_s17 = sld [smem:[#allocation2 + $0x3]]  ;;  %v27_v2 = vld [vmem:[%s321_s1 + $0x2] sm:$0x1]  ;;  %v28_v3 = vld [vmem:[%s321_s1 + $0x3] sm:$0x1] }
  0x11   :  { %s248_s18 = sld [smem:[#allocation2 + $0x4]]  ;;  %s253_s20 = sld [smem:[#allocation2 + $0xf]]  ;;  %v29_v8 = vld [vmem:[%s321_s1 + $0x4] sm:$0x1]  ;;  %vm140_vm0 = vcmask 57344  }
  0x12   :  { %s164_s21 = sld [smem:[#allocation2 + $0x5]]  ;;  %s165_s24 = sld [smem:[#allocation2 + $0x6]] }
  0x13   :  { %s166_s25 = sld [smem:[#allocation2 + $0x7]]  ;;  %s261_s28 = sld [smem:[#allocation2 + $0x8]] }
  0x14   :  { %s263_s29 = sld [smem:[#allocation2 + $0x9]]  ;;  %s268_s4 = sld [smem:[#allocation2 + $0xa]] }
  0x15   :  { %v31_v4 = vstv %s30_s14  ;;  %v34_v6 = vstv %s159_s15  ;;  %s270_s5 = sld [smem:[#allocation2 + $0xb]]  ;;  %s272_s6 = sld [smem:[#allocation2 + $0xc]] }
  0x16   :  { %v32_v5 = vmul.f32 %v31_v4, %v25_v0  ;;  %v38_v7 = vstv %s160_s16  ;;  %v35_v9 = vmul.f32 %v34_v6, %v26_v1  ;;  %v42_v11 = vstv %s161_s17  ;;  %s278_s9 = sld [smem:[#allocation2 + $0xd]]  ;;  %s280_s10 = sld [smem:[#allocation2 + $0xe]] }
  0x17   :  { %v39_v10 = vmul.f32 %v38_v7, %v27_v2  ;;  %v46_v12 = vstv %s248_s18  ;;  %v43_v13 = vmul.f32 %v42_v11, %v28_v3  ;;  %s282_s1 = sld [smem:[#allocation2 + $0x10]]  ;;  %v50_v24 = vstv %s253_s20  ;;  %s287_s11 = sld [smem:[#allocation2 + $0x12]] }
  0x18   :  { %v54_v14 = vstv %s164_s21  ;;  %v36_v15 = vadd.f32 %v35_v9, %v32_v5  ;;  %v57_v17 = vstv %s165_s24  ;;  %v47_v19 = vmul.f32 %v46_v12, %v29_v8  ;;  %s289_s12 = sld [smem:[#allocation2 + $0x15]]  ;;  %s294_s13 = sld [smem:[#allocation2 + $0x11]] }
  0x19   :  { %v55_v16 = vmul.f32 %v54_v14, %v25_v0  ;;  %v61_v18 = vstv %s166_s25  ;;  %v58_v20 = vmul.f32 %v57_v17, %v26_v1  ;;  %v65_v22 = vstv %s261_s28  ;;  %s296_s14 = sld [smem:[#allocation2 + $0x13]]  ;;  %s298_s15 = sld [smem:[#allocation2 + $0x16]] }
  0x1a   :  { %v62_v21 = vmul.f32 %v61_v18, %v27_v2  ;;  %v40_v23 = vadd.f32 %v39_v10, %v36_v15  ;;  %v66_v25 = vmul.f32 %v65_v22, %v28_v3  ;;  %v69_v26 = vstv %s263_s29  ;;  %s178_s16 = sld [smem:[#allocation2 + $0x14]]  ;;  %s182_s17 = sld [smem:[#allocation2 + $0x17]] }
  0x1b   :  { %v59_v27 = vadd.f32 %v58_v20, %v55_v16  ;;  %v77_v28 = vstv %s268_s4  ;;  %v80_v29 = vstv %s270_s5  ;;  %v84_v30 = vstv %s272_s6  ;;  %s179_s18 = sld [smem:[#allocation2 + $0x18]]  ;;  %s183_s0 = sld [smem:[#allocation2 + $0x19]] }
  0x1c   :  { %v44_v31 = vadd.f32 %v43_v13, %v40_v23  ;;  %v78_v32 = vmul.f32 %v77_v28, %v25_v0  ;;  %v81_v33 = vmul.f32 %v80_v29, %v26_v1  ;;  %v85_v34 = vmul.f32 %v84_v30, %v27_v2  ;;  %s229_s19 = smov [#allocation5]  }
  0x1d   :  { %v63_v35 = vadd.f32 %v62_v21, %v59_v27  ;;  %v70_v36 = vmul.f32 %v69_v26, %v29_v8  ;;  %v88_v37 = vstv %s278_s9  ;;  %v92_v38 = vstv %s280_s10  ;;  %s150_s20 = sshll.u32 %s229_s19, 4  ;;  %s151_s20 = int_to_ptr.vmem [resolvable:$true] %s150_s20 }
  0x1e   :  { %v48_v39 = vadd.f32 %v47_v19, %v44_v31  ;;  %v82_v40 = vadd.f32 %v81_v33, %v78_v32  ;;  %v89_v41 = vmul.f32 %v88_v37, %v28_v3  ;;  %v73_v44 = vstv %s282_s1  ;;  %s202_s21 = scalar_lea.vmem %s151_s20, 32  ;;  %p207_p6 = scmp.lt.s32.totalorder %s151_s20, %s151_s20 }
  0x1f   :  { %v67_v42 = vadd.f32 %v66_v25, %v63_v35  ;;  %v93_v46 = vmul.f32 %v92_v38, %v29_v8  ;;  %v100_v50 = vstv %s287_s11  ;;  %v115_v51 = vstv %s289_s12  ;;  %p203_p5 = scmp.ne.s32.totalorder %s151_s20, %s202_s21  ;;  %p208_p7 = scmp.lt.s32.totalorder %s202_s21, %s202_s21 }
  0x20   :  { %v51_v43 = vadd.f32 %v50_v24, %v48_v39  ;;  %v86_v45 = vadd.f32 %v85_v34, %v82_v40  ;;  %v96_v53 = vstv %s294_s13  ;;  %v103_v55 = vstv %s296_s14 }
  0x21   :  { %v71_v47 = vadd.f32 %v70_v36, %v67_v42  ;;  %v118_v56 = vstv %s298_s15  ;;  %v107_v62 = vstv %s178_s16  ;;  %v122_v0 = vstv %s182_s17  ;;  %p209_p8 = por %p208_p7, %p207_p6 }
  0x22   :  { %v52_v48 = vmax.f32 %v51_v43, 0.0  ;;  %v90_v49 = vadd.f32 %v89_v41, %v86_v45  ;;  %v111_v6 = vstv %s179_s18  ;;  %v126_v7 = vstv %s183_s0 }
  0x23   :  { %v74_v52 = vadd.f32 %v73_v44, %v71_v47  ;;  %p210_p9 = pnand %p209_p8, %p203_p5 }
  0x24   :  { %v94_v54 = vadd.f32 %v93_v46, %v90_v49  ;;  %v101_v58 = vmul.f32 %v100_v50, %v52_v48  ;;  %v116_v59 = vmul.f32 %v115_v51, %v52_v48 }
  0x25   :  { %v75_v57 = vmax.f32 %v74_v52, 0.0 }
  0x26   :  { %v97_v60 = vadd.f32 %v96_v53, %v94_v54 }
  0x27   :  { %v104_v61 = vmul.f32 %v103_v55, %v75_v57  ;;  %v119_v63 = vmul.f32 %v118_v56, %v75_v57 }
  0x28   :  { %v98_v1 = vmax.f32 %v97_v60, 0.0 }
  0x29   :  { %v105_v2 = vadd.f32 %v104_v61, %v101_v58  ;;  %v120_v3 = vadd.f32 %v119_v63, %v116_v59 }
  0x2a   :  { %v108_v4 = vmul.f32 %v107_v62, %v98_v1  ;;  %v123_v5 = vmul.f32 %v122_v0, %v98_v1 }
  0x2c   :  { %v109_v8 = vadd.f32 %v108_v4, %v105_v2  ;;  %v124_v9 = vadd.f32 %v123_v5, %v120_v3 }
  0x2e   :  { %v112_v10 = vadd.f32 %v111_v6, %v109_v8  ;;  %v127_v11 = vadd.f32 %v126_v7, %v124_v9 }
  0x30   :  { %v113_v12 = vmax.f32 %v112_v10, 0.0  ;;  %v128_v13 = vmax.f32 %v127_v11, 0.0 }
  0x32   :  { %v130_v14 = vsub.f32 %v113_v12, %v128_v13  ;;  %v129_v20 = vmax.f32 %v113_v12, %v128_v13 }
  0x34   :  { %v131_v15 = vand.u32 2147483647, %v130_v14 }
  0x36   :  { %v132_v16 = vsub.f32 0.0, %v131_v15 }
  0x38   :  { %v133_v17 = vmul.f32 1.442695, %v132_v16 }
  0x3a   :  { %186 = vpow2.f32 %v133_v17 }
  0x44   :  { %v187_v18 = vpop.eup %186 }
  0x45   :  { %v135_v19 = vadd.f32 1.0, %v187_v18 }
  0x47   :  { %188 = vlog2.f32 %v135_v19 }
  0x51   :  { %v189_v21 = vpop.eup %188 }
  0x52   :  { %v137_v22 = vmul.f32 0.6931472, %v189_v21 }
  0x54   :  { %v138_v23 = vadd.f32 %v137_v22, %v129_v20 }
  0x56   :  { %v139_v24 = vsub.f32 %v113_v12, %v138_v23  ;;  %v142_v25 = vsub.f32 %v128_v13, %v138_v23 }
  0x58   :  { %141 = vst.msk [vmem:[#allocation5] sm:$0x1] %vm140_vm0, %v139_v24  ;;  %143 = vst.msk [vmem:[#allocation5 + $0x1] sm:$0x1] %vm140_vm0, %v142_v25 }
  0x59   :  { %213 = shalt.err (!%p210_p9)
}
  0x5a   :  { %s214_s24 = scalar_lea.hbm %s322_s2, 32 }
  0x5b   :  { %p215_p10 = scmp.ne.s32.totalorder %s322_s2, %s214_s24  ;;  %p218_p11 = scmp.lt.u32.totalorder %s214_s24, %s322_s2 }
  0x5d   :  { %p220_p12 = pnand %p218_p11, %p215_p10 }
  0x5f   :  { %223 = shalt.err (!%p220_p12)
}
  0x60   :  { %153 = dma.vmem_to_hbm [thread:$0]  %s151_s20, 32, %s322_s2, [#allocation3]  }
  0x61   :  { %226 = dma.done.wait [#allocation3], 32  }
  0x62   :  { %227 = vsyncadd [#allocation3], 4294967264 }
  0x63   :  { %157 = vsyncpa [#allocation3], 1 }
  0x64   :  { %158 = vsyncpa [#allocation4], 1 }

</bundles_post_ra>
